<compile_context>
chip_gen: v7x
topology: tpu7x:2x2x1
jax: 0.10.0
libtpu: 0.0.40
codegen_flags: <defaults>
</compile_context>

<pallas_src>
import jax
import jax.numpy as jnp
from jax.experimental import pallas as pl
from jax.experimental.pallas import tpu as pltpu

INPUT_DIM = 9                                # len(features) in the reference module
HIDDEN = (16, 8, 4, 8, 16, INPUT_DIM)        # output dims of the 6 Linear layers
LAYER_DIMS = tuple(zip((INPUT_DIM,) + HIDDEN[:-1], HIDDEN))   # (in, out) per layer
RELU_LAYERS = (0, 1, 3, 4)                   # ReLU after these layers (not 2, 5)

ROWS_PER_LAYER = 16                          # >= max(out_features), multiple of 8
PACK_COLS = 128                              # one lane-tile wide
BIAS_COL = 16                                # column holding each layer's bias


def _autoencoder_kernel(x_ref, wp_ref, o_ref):
    """Fused forward pass for one (features, batch_tile) activation slab."""
    h = x_ref[...].astype(jnp.float32)                      # (INPUT_DIM, bt)
    for l, (fin, fout) in enumerate(LAYER_DIMS):
        r0 = ROWS_PER_LAYER * l
        w = wp_ref[r0:r0 + fout, 0:fin]                     # (fout, fin) static view
        b = wp_ref[r0:r0 + fout, BIAS_COL:BIAS_COL + 1]     # (fout, 1)
        h = jnp.dot(w, h, preferred_element_type=jnp.float32) + b
        if l in RELU_LAYERS:
            h = jnp.maximum(h, 0.0)                         # ReLU
    o_ref[...] = h.astype(o_ref.dtype)


def _round_up(x, m):
    return (x + m - 1) // m * m


def pack_params(params):
    """Pack all PyTorch-native (out, in) weights + biases into one f32 buffer."""
    buf = jnp.zeros((ROWS_PER_LAYER * len(params), PACK_COLS), jnp.float32)
    for l, (w, b) in enumerate(params):
        fout, fin = w.shape
        r0 = ROWS_PER_LAYER * l
        buf = buf.at[r0:r0 + fout, 0:fin].set(w)
        buf = buf.at[r0:r0 + fout, BIAS_COL].set(b)
    return buf


def autoencoder_forward(x, params, *, batch_tile=512):
    """x: (N, INPUT_DIM) float32.  params: list of (W (out,in), b (out,))."""
    n, d = x.shape
    assert d == INPUT_DIM

    # Batch tile: multiple of 128 lanes, no larger than the (padded) batch.
    bt = max(128, min(_round_up(batch_tile, 128), _round_up(n, 128)))
    n_pad = _round_up(n, bt)

    x_pad = x if n_pad == n else jnp.pad(x, ((0, n_pad - n), (0, 0)))
    x_t = x_pad.T                                  # (INPUT_DIM, n_pad): batch on lanes

    packed = pack_params(params)

    flops_per_row = 2 * sum(fi * fo for fi, fo in LAYER_DIMS)
    cost = pl.CostEstimate(
        flops=int(flops_per_row * n_pad),
        transcendentals=0,
        bytes_accessed=int(2 * n_pad * INPUT_DIM * 4 + packed.size * 4),
    )

    out_t = pl.pallas_call(
        _autoencoder_kernel,
        out_shape=jax.ShapeDtypeStruct((INPUT_DIM, n_pad), x.dtype),
        grid_spec=pl.GridSpec(
            grid=(n_pad // bt,),
            in_specs=[
                pl.BlockSpec((INPUT_DIM, bt), lambda i: (0, i)),
                # Whole packed-parameter buffer, resident across all grid steps.
                pl.BlockSpec(packed.shape, lambda i: (0, 0)),
            ],
            out_specs=pl.BlockSpec((INPUT_DIM, bt), lambda i: (0, i)),
        ),
        compiler_params=pltpu.CompilerParams(
            dimension_semantics=("parallel",),
            vmem_limit_bytes=32 * 1024 * 1024,
        ),
        cost_estimate=cost,
    )(x_t, packed)

    return out_t.T[:n]


def make_params(key):
    """Deterministic init (Kaiming-uniform-ish, PyTorch-native (out, in) weights)."""
    params = []
    for fan_in, fan_out in LAYER_DIMS:
        key, kw, kb = jax.random.split(key, 3)
        bound = fan_in ** -0.5
        w = jax.random.uniform(kw, (fan_out, fan_in), jnp.float32, -bound, bound)
        b = jax.random.uniform(kb, (fan_out,), jnp.float32, -bound, bound)
        params.append((w, b))
    return params


def reference_forward(x, params):
    """Pure-JAX reference mirroring the PyTorch module exactly."""
    h = x
    for li, (w, b) in enumerate(params):
        h = h @ w.T + b
        if li in RELU_LAYERS:
            h = jnp.maximum(h, 0.0)
    return h


if __name__ == "__main__":
    key = jax.random.PRNGKey(0)
    key, kx = jax.random.split(key)

    batch = 1000                    # non-multiple of the tile: exercises padding path
    x = jax.random.normal(kx, (batch, INPUT_DIM), jnp.float32)
    params = make_params(key)

    # batch_tile=512 -> padded batch 1024, grid=(2,) so both v7x TCs get a step.
    out = autoencoder_forward(x, params, batch_tile=512)
    out = jax.block_until_ready(out)

    ref = reference_forward(x, params)
    assert out.shape == (batch, INPUT_DIM)
    # Tolerance covers MXU default-precision / accumulation-order differences
    # between the (W @ x) kernel layout and the (x @ W.T) reference.
    assert jnp.allclose(out, ref, atol=1e-4, rtol=1e-4), "mismatch vs reference"

    print("KERNEL_OK")
</pallas_src>

<mosaic_0001>
module attributes {stable_mosaic.version = 11 : i64} {
  func.func @_autoencoder_kernel(%arg0: i32, %arg1: memref<9x512xf32, #tpu.memory_space<vmem>>, %arg2: memref<96x128xf32, #tpu.memory_space<vmem>>, %arg3: memref<9x512xf32, #tpu.memory_space<vmem>>) attributes {dimension_semantics = [#tpu.dimension_semantics<parallel>], iteration_bounds = array<i64: 2>, scalar_prefetch = 0 : i64, scratch_operands = 0 : i64, tpu.core_type = #tpu.core_type<tc>, window_params = [{transform_indices = @transform_0, window_bounds = array<i64: 9, 512>}, {pipeline_mode = #tpu.pipeline_mode<synchronous>, transform_indices = @transform_1, window_bounds = array<i64: 96, 128>}, {transform_indices = @transform_2, window_bounds = array<i64: 9, 512>}]} {
    %c0 = arith.constant 0 : index
    %c0_0 = arith.constant 0 : index
    %0 = vector.load %arg1[%c0, %c0_0] : memref<9x512xf32, #tpu.memory_space<vmem>>, vector<9x512xf32>
    %c0_1 = arith.constant 0 : index
    %c0_2 = arith.constant 0 : index
    %1 = vector.load %arg2[%c0_1, %c0_2] : memref<96x128xf32, #tpu.memory_space<vmem>>, vector<16x9xf32>
    %c0_3 = arith.constant 0 : index
    %c16 = arith.constant 16 : index
    %2 = vector.load %arg2[%c0_3, %c16] : memref<96x128xf32, #tpu.memory_space<vmem>>, vector<16x1xf32>
    %cst = arith.constant dense<0.000000e+00> : vector<16x512xf32>
    %3 = tpu.matmul %1, %0, %cst {dimension_numbers = #tpu.dot_dimension_numbers<[1], [0], [0], [1], [0, 0, 1, 1], [], []>} : vector<16x9xf32>, vector<9x512xf32>, vector<16x512xf32> -> vector<16x512xf32>
    %4 = vector.broadcast %2 : vector<16x1xf32> to vector<16x512xf32>
    %5 = arith.addf %3, %4 : vector<16x512xf32>
    %cst_4 = arith.constant 0.000000e+00 : f32
    %6 = vector.broadcast %cst_4 : f32 to vector<16x512xf32>
    %7 = arith.maximumf %5, %6 : vector<16x512xf32>
    %c16_5 = arith.constant 16 : index
    %c0_6 = arith.constant 0 : index
    %8 = vector.load %arg2[%c16_5, %c0_6] : memref<96x128xf32, #tpu.memory_space<vmem>>, vector<8x16xf32>
    %c16_7 = arith.constant 16 : index
    %c16_8 = arith.constant 16 : index
    %9 = vector.load %arg2[%c16_7, %c16_8] : memref<96x128xf32, #tpu.memory_space<vmem>>, vector<8x1xf32>
    %cst_9 = arith.constant dense<0.000000e+00> : vector<8x512xf32>
    %10 = tpu.matmul %8, %7, %cst_9 {dimension_numbers = #tpu.dot_dimension_numbers<[1], [0], [0], [1], [0, 0, 1, 1], [], []>} : vector<8x16xf32>, vector<16x512xf32>, vector<8x512xf32> -> vector<8x512xf32>
    %11 = vector.broadcast %9 : vector<8x1xf32> to vector<8x512xf32>
    %12 = arith.addf %10, %11 : vector<8x512xf32>
    %cst_10 = arith.constant 0.000000e+00 : f32
    %13 = vector.broadcast %cst_10 : f32 to vector<8x512xf32>
    %14 = arith.maximumf %12, %13 : vector<8x512xf32>
    %c32 = arith.constant 32 : index
    %c0_11 = arith.constant 0 : index
    %15 = vector.load %arg2[%c32, %c0_11] : memref<96x128xf32, #tpu.memory_space<vmem>>, vector<4x8xf32>
    %c32_12 = arith.constant 32 : index
    %c16_13 = arith.constant 16 : index
    %16 = vector.load %arg2[%c32_12, %c16_13] : memref<96x128xf32, #tpu.memory_space<vmem>>, vector<4x1xf32>
    %cst_14 = arith.constant dense<0.000000e+00> : vector<4x512xf32>
    %17 = tpu.matmul %15, %14, %cst_14 {dimension_numbers = #tpu.dot_dimension_numbers<[1], [0], [0], [1], [0, 0, 1, 1], [], []>} : vector<4x8xf32>, vector<8x512xf32>, vector<4x512xf32> -> vector<4x512xf32>
    %18 = vector.broadcast %16 : vector<4x1xf32> to vector<4x512xf32>
    %19 = arith.addf %17, %18 : vector<4x512xf32>
    %c48 = arith.constant 48 : index
    %c0_15 = arith.constant 0 : index
    %20 = vector.load %arg2[%c48, %c0_15] : memref<96x128xf32, #tpu.memory_space<vmem>>, vector<8x4xf32>
    %c48_16 = arith.constant 48 : index
    %c16_17 = arith.constant 16 : index
    %21 = vector.load %arg2[%c48_16, %c16_17] : memref<96x128xf32, #tpu.memory_space<vmem>>, vector<8x1xf32>
    %cst_18 = arith.constant dense<0.000000e+00> : vector<8x512xf32>
    %22 = tpu.matmul %20, %19, %cst_18 {dimension_numbers = #tpu.dot_dimension_numbers<[1], [0], [0], [1], [0, 0, 1, 1], [], []>} : vector<8x4xf32>, vector<4x512xf32>, vector<8x512xf32> -> vector<8x512xf32>
    %23 = vector.broadcast %21 : vector<8x1xf32> to vector<8x512xf32>
    %24 = arith.addf %22, %23 : vector<8x512xf32>
    %cst_19 = arith.constant 0.000000e+00 : f32
    %25 = vector.broadcast %cst_19 : f32 to vector<8x512xf32>
    %26 = arith.maximumf %24, %25 : vector<8x512xf32>
    %c64 = arith.constant 64 : index
    %c0_20 = arith.constant 0 : index
    %27 = vector.load %arg2[%c64, %c0_20] : memref<96x128xf32, #tpu.memory_space<vmem>>, vector<16x8xf32>
    %c64_21 = arith.constant 64 : index
    %c16_22 = arith.constant 16 : index
    %28 = vector.load %arg2[%c64_21, %c16_22] : memref<96x128xf32, #tpu.memory_space<vmem>>, vector<16x1xf32>
    %cst_23 = arith.constant dense<0.000000e+00> : vector<16x512xf32>
    %29 = tpu.matmul %27, %26, %cst_23 {dimension_numbers = #tpu.dot_dimension_numbers<[1], [0], [0], [1], [0, 0, 1, 1], [], []>} : vector<16x8xf32>, vector<8x512xf32>, vector<16x512xf32> -> vector<16x512xf32>
    %30 = vector.broadcast %28 : vector<16x1xf32> to vector<16x512xf32>
    %31 = arith.addf %29, %30 : vector<16x512xf32>
    %cst_24 = arith.constant 0.000000e+00 : f32
    %32 = vector.broadcast %cst_24 : f32 to vector<16x512xf32>
    %33 = arith.maximumf %31, %32 : vector<16x512xf32>
    %c80 = arith.constant 80 : index
    %c0_25 = arith.constant 0 : index
    %34 = vector.load %arg2[%c80, %c0_25] : memref<96x128xf32, #tpu.memory_space<vmem>>, vector<9x16xf32>
    %c80_26 = arith.constant 80 : index
    %c16_27 = arith.constant 16 : index
    %35 = vector.load %arg2[%c80_26, %c16_27] : memref<96x128xf32, #tpu.memory_space<vmem>>, vector<9x1xf32>
    %cst_28 = arith.constant dense<0.000000e+00> : vector<9x512xf32>
    %36 = tpu.matmul %34, %33, %cst_28 {dimension_numbers = #tpu.dot_dimension_numbers<[1], [0], [0], [1], [0, 0, 1, 1], [], []>} : vector<9x16xf32>, vector<16x512xf32>, vector<9x512xf32> -> vector<9x512xf32>
    %37 = vector.broadcast %35 : vector<9x1xf32> to vector<9x512xf32>
    %38 = arith.addf %36, %37 : vector<9x512xf32>
    %c0_29 = arith.constant 0 : index
    %c0_30 = arith.constant 0 : index
    %39 = vector.load %arg3[%c0_29, %c0_30] : memref<9x512xf32, #tpu.memory_space<vmem>>, vector<9x512xf32>
    tpu.vector_store %arg3[%c0_29, %c0_30], %38 {strides = array<i32>} : memref<9x512xf32, #tpu.memory_space<vmem>>, vector<9x512xf32>,
    return
  }
  func.func @transform_0(%arg0: i32) -> (i32, i32) {
    %c0_i32 = arith.constant 0 : i32
    %c0_i32_0 = arith.constant 0 : i32
    return %c0_i32, %arg0 : i32, i32
  }
  func.func @transform_1(%arg0: i32) -> (i32, i32) {
    %c0_i32 = arith.constant 0 : i32
    %c0_i32_0 = arith.constant 0 : i32
    %c0_i32_1 = arith.constant 0 : i32
    return %c0_i32, %c0_i32_0 : i32, i32
  }
  func.func @transform_2(%arg0: i32) -> (i32, i32) {
    %c0_i32 = arith.constant 0 : i32
    %c0_i32_0 = arith.constant 0 : i32
    return %c0_i32, %arg0 : i32, i32
  }
}

</mosaic_0001>

<bundles_post_ra>
// kernel: tpu_custom_call.1
= control target key start
LH: loop header
LB: loop body
LE: loop exit
PB: predicated region body
PF: predicated region fallthrough
CT: control target
= control target key end

     0   :  { %7 = vsyncpa [#allocation3], 0  ;;  %s1883_s0 = inlined_call_operand.hbm [shape: f32[9,1024], index: 0, kind: input, shape index: {}]   ;;  %s1884_s1 = inlined_call_operand.hbm [shape: f32[96,128], index: 1, kind: input, shape index: {}]   ;;  %s1885_s2 = inlined_call_operand.hbm [shape: f32[9,1024], index: 2, kind: output, shape index: {}]  }
   0x1   :  { %9 = vsyncpa [#allocation3 + $0x1], 0 }
   0x2   :  { %10 = vsyncpa [#allocation6], 0 }
   0x3   :  { %11 = vsyncpa [#allocation4], 0 }
   0x4   :  { %13 = vsyncpa [#allocation4 + $0x1], 0  ;;  %s1607_s9 = smov 0   ;;  %s1609_s10 = smov 0  }
   0x5   :  { %s1611_s11 = smov 0   ;;  %s1613_s12 = smov 0  }
   0x6 LB: > { %s1628_s13 = sadd.s32 4294967295, %s1576_s12   ;;  %s1306_s14 = sadd.s32 4294967294, %s1576_s12   ;;  %s1576_s12 = sphi %s1613_s12, %s1911_s12   ;;  %s1572_s11 = sphi %s1611_s11, %s1910_s11   ;;  %s1568_s10 = sphi %s1609_s10, %s1909_s10   ;;  %s1564_s9 = sphi %s1607_s9, %s1908_s9  }
   0x7   : > { %s1632_s15 = sadd.s32 1, %s1576_s12   ;;  %s26_s16 = sadd.s32 1, %s1572_s11 }
   0x8   : > { %s23_s17 = ssub.s32 %s1576_s12, %s1632_s15  ;;  %p33_p0 = scmp.ne.s32.totalorder %s1572_s11, %s1568_s10 }
   0x9   : > { %p24_p1 = scmp.eq.s32.totalorder %s23_s17, 0  ;;  %p34_p2 = scmp.eq.s32.totalorder %s1576_s12, 0 }
   0xa   : > { %p39_p3 = scmp.ne.s32.totalorder %s1568_s10, %s1564_s9  ;;  %p1886_p4 = scmp.eq.s32.totalorder %s1628_s13, 0 }
   0xb   : > { %s1644_s18 = scalar_select %p24_p1, %s1572_s11, %s26_s16  }
   0xc   : > { %p1646_p5 = por %p34_p2, %p33_p0  ;;  %p1652_p6 = por %p1886_p4, %p39_p3 }
   0xd   : > { %p84_p7 = scmp.eq.s32.totalorder %s1628_s13, 1  ;;  %p90_p8 = scmp.eq.s32.totalorder %s1306_s14, 1 }
   0xe   : > { %s1890_s19 = scalar_select %p1646_p5, 1, 0 }
   0xf   : > { %s1891_s20 = scalar_select %p1652_p6, 1, 0 }
  0x10   : > { %p1307_p9 = scmp.ge.s32.totalorder %s1576_s12, 1  ;;  %p97_p10 = scmp.lt.s32.totalorder %s1576_s12, 3 }
  0x11   : > { %p1659_p11 = por %p84_p7, %p33_p0  ;;  %p1663_p12 = por %p90_p8, %p39_p3 }
  0x12   : > { %p1667_p13 = pnand %p1307_p9, %p97_p10  ;;  %s1578_s24 = smov [#allocation5]  }
  0x13   : > { %s1892_s21 = scalar_select %p1659_p11, 1, 0 }
  0x14   : > { %s1893_s22 = scalar_select %p1663_p12, 1, 0 }
  0x15   : > { %s1894_s23 = scalar_select %p1667_p13, 1, 0 }
  0x16   : > { %p1386_p1 = pneg %p1667_p13  ;;  %s109_s25 = sshll.u32 %s1578_s24, 4  ;;  %s110_s25 = int_to_ptr.vmem [resolvable:$true] %s109_s25 }
  0x17   : > { %s123_s27 = sand.u32 1, %s1572_s11   ;;  %s1448_s30 = scalar_lea.hbm %s1884_s1, 1536 }
  0x18   : > { %p1675_p2 = pnand %p1386_p1, %p1886_p4  ;;  %p1449_p7 = scmp.ne.s32.totalorder %s1884_s1, %s1448_s30 }
  0x19   : > { %p1455_p1 = scmp.lt.u32.totalorder %s1448_s30, %s1884_s1 }
  0x1a   : > { %p1450_p8 = pneg %p1675_p2 }
  0x1c   : > { %p1451_p9 = pnand %p1450_p8, %p1449_p7 }
  0x1e   : > { %p1452_p10 = pneg %p1451_p9 }
  0x20   : > { %p1457_p4 = pnand %p1455_p1, %p1452_p10 }
  0x22   : > { %1460 = shalt.err (!%p1457_p4)
}
  0x23   : > { %s1461_s7 = scalar_lea.vmem %s110_s25, 1536  ;;  %p1469_p11 = scmp.lt.s32.totalorder %s110_s25, %s110_s25 }
  0x24   : > { %p1462_p0 = scmp.ne.s32.totalorder %s110_s25, %s1461_s7  ;;  %p1470_p6 = scmp.lt.s32.totalorder %s1461_s7, %s1461_s7 }
  0x26   : > { %p1464_p3 = pnand %p1462_p0, %p1450_p8  ;;  %p1471_p13 = por %p1470_p6, %p1469_p11 }
  0x28   : > { %p1465_p12 = pneg %p1464_p3 }
  0x2a   : > { %p1472_p5 = pnand %p1471_p13, %p1465_p12 }
  0x2c   : > { %1475 = shalt.err (!%p1472_p5)
}
  0x2d   : > { %s1579_s8 = smov 128   ;;  %s1580_s14 = smov 8  }
  0x2e   : > { %1389 = dma.hbm_to_vmem [thread:$0]  (!%p1675_p2), %s1884_s1, 1536, %s110_s25, [#allocation6], %s1579_s8, %s1579_s8, %s1580_s14  }
  0x2f   : > { %p1896_p4 = scmp.ne.s32.totalorder %s1890_s19, 0  ;;  %p1897_p7 = scmp.lt.s32.totalorder %s1576_s12, 2 }
  0x30   : > { %s1310_s28 = sshll.u32 %s123_s27, 6  ;;  %s1348_s29 = sshll.u32 %s1576_s12, 9 }
  0x31   : > { %p1702_p0 = pnand %p1897_p7, %p1896_p4  ;;  %s1710_s4 = scalar_lea.hbm %s1883_s0, %s1348_s29 }
  0x32   : > { %s127_s25 = scalar_lea.vmem [#allocation2], %s1310_s28  ;;  %s1714_s26 = scalar_lea.sflag [#allocation3], %s123_s27 }
  0x33   : > { %s134_s19 = sshll.u32 %s127_s25, 4  ;;  %s1476_s5 = scalar_lea.hbm %s1710_s4, 1024  ;;  %s1712_s19 = int_to_ptr.vmem [resolvable:$true] %s134_s19 }
  0x34   : > { %p1477_p5 = scmp.ne.s32.totalorder %s1710_s4, %s1476_s5  ;;  %p1478_p6 = pneg %p1702_p0 }
  0x35   : > { %s1481_s8 = scalar_lea.hbm %s1883_s0, 2048  ;;  %p1482_p13 = scmp.lt.u32.totalorder %s1710_s4, %s1883_s0 }
  0x36   : > { %p1479_p11 = pnand %p1478_p6, %p1477_p5  ;;  %p1483_p2 = scmp.lt.u32.totalorder %s1481_s8, %s1476_s5 }
  0x37   : > { %p1485_p8 = scmp.lt.u32.totalorder %s1476_s5, %s1710_s4 }
  0x38   : > { %p1480_p12 = pneg %p1479_p11  ;;  %p1484_p3 = por %p1483_p2, %p1482_p13 }
  0x3a   : > { %p1486_p9 = por %p1485_p8, %p1484_p3 }
  0x3c   : > { %p1487_p10 = pnand %p1486_p9, %p1480_p12 }
  0x3e   : > { %1490 = shalt.err (!%p1487_p10)
}
  0x3f   : > { %s1491_s27 = scalar_lea.vmem %s1712_s19, 1024  ;;  %s1581_s17 = smov [#allocation2]  }
  0x40   : > { %p1492_p1 = scmp.ne.s32.totalorder %s1712_s19, %s1491_s27  ;;  %s1496_s28 = sshll.u32 %s1581_s17, 4  ;;  %s1497_s28 = int_to_ptr.vmem [resolvable:$false] %s1496_s28 }
  0x41   : > { %s1498_s29 = scalar_lea.vmem %s1497_s28, 2048  ;;  %p1499_p5 = scmp.lt.s32.totalorder %s1712_s19, %s1497_s28 }
  0x42   : > { %p1494_p4 = pnand %p1492_p1, %p1478_p6  ;;  %p1500_p11 = scmp.lt.s32.totalorder %s1498_s29, %s1491_s27 }
  0x44   : > { %p1495_p7 = pneg %p1494_p4  ;;  %p1501_p13 = por %p1500_p11, %p1499_p5 }
  0x46   : > { %p1502_p2 = pnand %p1501_p13, %p1495_p7 }
  0x48   : > { %1505 = shalt.err (!%p1502_p2)
}
  0x49   : > { %s1582_s30 = smov 1024   ;;  %s1583_s3 = smov 512  }
  0x4a   : > { %s1584_s25 = smov 32   ;;  %p1899_p6 = scmp.ne.s32.totalorder %s1894_s23, 0 }
  0x4b   : > { %1393 = dma.hbm_to_vmem [thread:$0]  (!%p1702_p0), %s1710_s4, 1024, %s1712_s19, %s1714_s26, %s1582_s30, %s1583_s3, %s1584_s25  }
  0x4c   : > { %146 = sbr.rel (%p1899_p6) target bundleno = 1441 (0x5a1), region = 28  ;;  %s1745_s5 = sand.u32 (!%p1899_p6), 1, %s1568_s10  }
  0x4d   : > { %s1314_s6 = sshll.u32 (!%p1899_p6), %s1745_s5, 6  ;;  %s149_s7 = scalar_lea.sflag (!%p1899_p6), [#allocation3], %s1745_s5 }
  0x4e   : > { %s152_s8 = scalar_lea.vmem (!%p1899_p6), [#allocation2], %s1314_s6  ;;  %p1900_p12 = scmp.ne.s32.totalorder (!%p1899_p6), %s1891_s20, 0 }
  0x53   : > { %1551 = dma.done.wait (%p1900_p12), %s149_s7, 1024  }
  0x54   : > { %1553 = vsyncadd (%p1900_p12), %s149_s7, 4294966272  ;;  %p1901_p0 = scmp.eq.s32.totalorder %s1628_s13, 0 }
  0x56   : > { %1555 = dma.done.wait (%p1901_p0), [#allocation6], 1536   ;;  %p1902_p3 = pmov %p1901_p0 }
  0x57   : > { %v1585_v0 = vmov 0.0   ;;  %v1586_v1 = vmov 16   ;;  %vm204_vm0 = vcmask 1040384   ;;  %vm1587_vm1 = vmmov 1   ;;  %v180_v3 = vld [vmem:[%s152_s8 + $0x8] sm:$0xff]  ;;  %v182_v5 = vld [vmem:[%s152_s8 + $0x18] sm:$0xff] }
  0x58   : > { %1557 = vsyncadd (%p1902_p3), [#allocation6], 4294965760  ;;  %281 = vmatprep.mubr.f32.mxu0 %v1585_v0  ;;  %358 = vmatprep.mubr.f32.mxu1 %v1585_v0  ;;  %v184_v4 = vld [vmem:[%s152_s8 + $0x28] sm:$0x1]  ;;  %v186_v7 = vld [vmem:[%s152_s8 + $0x38] sm:$0x1] }
  0x59   : > { %1446 = vset.pattern.permute.xlu0 %v1586_v1  ;;  %1447 = vset.pattern.permute.xlu1 %v1586_v1  ;;  %vm1761_vm2 = vmpackc.low %vm204_vm0, %vm1587_vm1  ;;  %v1350_v6 = vpack.c.bf16 %v184_v4, %v180_v3  ;;  %v179_v8 = vld [vmem:[%s152_s8] sm:$0xff]  ;;  %v1356_v10 = vpack.c.bf16 %v186_v7, %v182_v5  ;;  %v181_v12 = vld [vmem:[%s152_s8 + $0x10] sm:$0xff]  ;;  %vm199_vm3 = vcmask 72704   ;;  %vm385_vm4 = vcmask 130048   ;;  %s176_s20 = scalar_lea.vmem [#allocation7], %s1314_s6  ;;  %s1349_s24 = sshll.u32 %s1628_s13, 9 }
  0x5a   : > { %v183_v9 = vld [vmem:[%s152_s8 + $0x20] sm:$0x1]  ;;  %v185_v13 = vld [vmem:[%s152_s8 + $0x30] sm:$0x1]  ;;  %v188_v16 = vld [vmem:[#allocation5 + $0x8] sm:$0xff]  ;;  %vm540_vm5 = vcmask 64512   ;;  %s1839_s13 = scalar_lea.hbm %s1885_s2, %s1349_s24 }
  0x5b   : > { %v1353_v11 = vpack.c.bf16 %v183_v9, %v179_v8  ;;  %v187_v14 = vld [vmem:[#allocation5] sm:$0xff]  ;;  %1352 = vmatprep.subr.msk.bf16.mxu0 %vm1761_vm2, %v1350_v6  ;;  %v1359_v15 = vpack.c.bf16 %v185_v13, %v181_v12  ;;  %1358 = vmatprep.subr.msk.bf16.mxu1 %vm1761_vm2, %v1356_v10  ;;  %v1774_v17 = vld [vmem:[#allocation5 + $0x30] sm:$0xff]  ;;  %v1778_v18 = vld [vmem:[#allocation5 + $0x48] sm:$0xff]  ;;  %vm694_vm6 = vcmask 1043456   ;;  %vm691_vm7 = vcmask 31744   ;;  %s1223_s23 = sshll.u32 %s176_s20, 4  ;;  %s1834_s23 = int_to_ptr.vmem [resolvable:$true] %s1223_s23 }
  0x5c   : > { %191 = vperm.xlu0 %1446, %v187_v14   ;;  %v1783_v19 = vld [vmem:[#allocation5 + $0x58] sm:$0x1]  ;;  %v379_v20 = vld [vmem:[#allocation5 + $0x10] sm:$0xff]  ;;  %v1786_v21 = vld [vmem:[#allocation5 + $0x20] sm:$0xf]  ;;  %s1210_s26 = scalar_lea.sflag [#allocation4], %s1745_s5 }
  0x5d   : > { %1355 = vmatpush1.bf16.msk.msra.mxu0 %vm1761_vm2, %v1353_v11  ;;  %1361 = vmatpush1.bf16.msk.msra.mxu1 %vm1761_vm2, %v1359_v15  ;;  %v1789_v22 = vld [vmem:[#allocation5 + $0x40] sm:$0xff]  ;;  %v1792_v23 = vld [vmem:[#allocation5 + $0x50] sm:$0xff]  ;;  %s1506_s14 = scalar_lea.vmem %s1834_s23, 1024  ;;  %p1905_p9 = scmp.ne.s32.totalorder %s1892_s21, 0 }
  0x5e   : > { %382 = vperm.xlu1 %1447, %v379_v20   ;;  %p1507_p8 = scmp.ne.s32.totalorder %s1834_s23, %s1506_s14  ;;  %s1588_s16 = smov [#allocation7]  }
  0x5f   : > { %s1510_s27 = sshll.u32 %s1588_s16, 4  ;;  %s1511_s27 = int_to_ptr.vmem [resolvable:$false] %s1510_s27 }
  0x60   : > { %1319 = vmatmul.mubr.msk.f32.vlgmr.msra.gmra.mrb[0].mxu0 %vm199_vm3, %v187_v14  ;;  %196 = vperm.xlu0 %1446, %v188_v16   ;;  %p1508_p10 = pnand %p1507_p8, %p1905_p9  ;;  %s1512_s17 = scalar_lea.vmem %s1511_s27, 2048 }
  0x61   : > { %1323 = vmatmul.mubr.msk.f32.vlgmr.msra.gmra.mrb[0].mxu1 %vm199_vm3, %v187_v14  ;;  %287 = vmatprep.mubr.f32.mxu0 %v1585_v0  ;;  %p1513_p4 = scmp.lt.s32.totalorder %s1834_s23, %s1511_s27  ;;  %p1514_p7 = scmp.lt.s32.totalorder %s1512_s17, %s1506_s14 }
  0x62   : > { %364 = vmatprep.mubr.f32.mxu1 %v1585_v0  ;;  %537 = vperm.xlu1 %1447, %v1786_v21   ;;  %p1509_p1 = pneg %p1508_p10 }
  0x63   : > { %p1515_p5 = por %p1514_p7, %p1513_p4 }
  0x64   : > { %1320 = vmatmul.mubr.msk.f32.gmra.mrb[2].mxu0 %vm199_vm3, %v188_v16  ;;  %688 = vperm.xlu0 %1446, %v1774_v17  }
  0x65   : > { %1324 = vmatmul.mubr.msk.f32.gmra.mrb[2].mxu1 %vm199_vm3, %v188_v16  ;;  %452 = vmatprep.mubr.f32.mxu0 %v1585_v0  ;;  %p1516_p11 = pnand %p1515_p5, %p1509_p1 }
  0x66   : > { %523 = vmatprep.mubr.f32.mxu1 %v1585_v0  ;;  %857 = vperm.xlu1 %1447, %v1789_v22  }
  0x68   : > { %862 = vperm.xlu0 %1446, %v1778_v18  }
  0x6a   : > { %1035 = vperm.xlu1 %1447, %v1792_v23  }
  0x6c   : > { %1040 = vperm.xlu0 %1446, %v1783_v19  }
  0xdb   : > { %v192_v24 = vpop.permute.xlu0 %191 }
  0xdd   : > { %v383_v54 = vpop.permute.xlu1 %382 }
  0xdf   : > { %v197_v30 = vpop.permute.xlu0 %196 }
  0xe1   : > { %v538_v4 = vpop.permute.xlu1 %537 }
  0xe3   : > { %v689_v13 = vpop.permute.xlu0 %688 }
 0x133   : > { %v283_v25 = vpop.f32.mrb[0].mxu0 }
 0x134   : > { %v360_v26 = vpop.f32.mrb[0].mxu1  ;;  %v285_v27 = vpop.f32.mrb[1].mxu0  ;;  %v284_v29 = vadd.f32 %v283_v25, %v192_v24 }
 0x135   : > { %v362_v28 = vpop.f32.mrb[1].mxu1  ;;  %v361_v31 = vadd.f32 %v360_v26, %v192_v24  ;;  %v286_v32 = vadd.f32 %v285_v27, %v192_v24 }
 0x136   : > { %v363_v34 = vadd.f32 %v362_v28, %v192_v24  ;;  %v371_v41 = vmax.f32 %v284_v29, 0.0 }
 0x137   : > { %v289_v33 = vpop.f32.mrb[2].mxu0  ;;  %v373_v44 = vmax.f32 %v361_v31, 0.0  ;;  %v372_v45 = vmax.f32 %v286_v32, 0.0 }
 0x138   : > { %v290_v35 = vadd.f32 %v289_v33, %v197_v30  ;;  %v366_v36 = vpop.f32.mrb[2].mxu1  ;;  %v291_v37 = vpop.f32.mrb[3].mxu0  ;;  %v374_v48 = vmax.f32 %v363_v34, 0.0 }
 0x139   : > { %v367_v38 = vadd.f32 %v366_v36, %v197_v30  ;;  %v292_v39 = vadd.f32 %v291_v37, %v197_v30  ;;  %v368_v40 = vpop.f32.mrb[3].mxu1  ;;  %v858_v33 = vpop.permute.xlu1 %857 }
 0x13a   : > { %v375_v42 = vmax.f32 %v290_v35, 0.0  ;;  %v369_v43 = vadd.f32 %v368_v40, %v197_v30  ;;  %v863_v35 = vpop.permute.xlu0 %862 }
 0x13b   : > { %v377_v46 = vmax.f32 %v367_v38, 0.0  ;;  %v376_v47 = vmax.f32 %v292_v39, 0.0 }
 0x13c   : > { %v1364_v49 = vpack.c.bf16 %v375_v42, %v371_v41  ;;  %v378_v50 = vmax.f32 %v369_v43, 0.0 }
 0x13d   : > { %v1368_v51 = vpack.c.bf16 %v377_v46, %v373_v44  ;;  %v1362_v52 = vpack.c.bf16 %v376_v47, %v372_v45 }
 0x13e   : > { %v1366_v53 = vpack.c.bf16 %v378_v50, %v374_v48 }
 0x13f   : > { %1363 = vmatprep.subr.bf16.mxu0 %v1362_v52 }
 0x140   : > { %1367 = vmatprep.subr.bf16.mxu1 %v1366_v53  ;;  %1365 = vmatpush1.bf16.msra.mxu0 %v1364_v49 }
 0x141   : > { %1369 = vmatpush1.bf16.msra.mxu1 %v1368_v51 }
 0x143   : > { %1325 = vmatmul.mubr.msk.f32.vlgmr.msra.gmra.mrb[4].mxu0 %vm385_vm4, %v379_v20 }
 0x144   : > { %1326 = vmatmul.mubr.msk.f32.vlgmr.msra.gmra.mrb[4].mxu1 %vm385_vm4, %v379_v20  ;;  %607 = vmatprep.mubr.f32.mxu0 %v1585_v0 }
 0x145   : > { %678 = vmatprep.mubr.f32.mxu1 %v1585_v0 }
 0x216   : > { %v454_v55 = vpop.f32.mrb[4].mxu0 }
 0x217   : > { %v455_v56 = vadd.f32 %v454_v55, %v383_v54  ;;  %v525_v57 = vpop.f32.mrb[4].mxu1  ;;  %v456_v58 = vpop.f32.mrb[5].mxu0 }
 0x218   : > { %v526_v59 = vadd.f32 %v525_v57, %v383_v54  ;;  %v457_v60 = vadd.f32 %v456_v58, %v383_v54  ;;  %v527_v61 = vpop.f32.mrb[5].mxu1  ;;  %v1036_v58 = vpop.permute.xlu1 %1035 }
 0x219   : > { %v528_v62 = vadd.f32 %v527_v61, %v383_v54  ;;  %v530_v1 = vmax.f32 %v455_v56, 0.0 }
 0x21a   : > { %v531_v63 = vmax.f32 %v457_v60, 0.0  ;;  %v532_v3 = vmax.f32 %v526_v59, 0.0 }
 0x21b   : > { %v533_v2 = vmax.f32 %v528_v62, 0.0 }
 0x21c   : > { %543 = vmatprep.subr.mxu0 %v531_v63 }
 0x21d   : > { %614 = vmatprep.subr.mxu1 %v533_v2  ;;  %544 = vmatpush1.msra.mxu0 %v530_v1 }
 0x21e   : > { %615 = vmatpush1.msra.mxu1 %v532_v3  ;;  %1327 = vmatmul.mubr.msk.f32.vlgmr.msra.gmra.mrb[6].mxu0 %vm540_vm5, %v1786_v21 }
 0x21f   : > { %1328 = vmatmul.mubr.msk.f32.vlgmr.msra.gmra.mrb[6].mxu1 %vm540_vm5, %v1786_v21  ;;  %771 = vmatprep.mubr.f32.mxu0 %v1585_v0 }
 0x220   : > { %842 = vmatprep.mubr.f32.mxu1 %v1585_v0 }
 0x2f1   : > { %v609_v5 = vpop.f32.mrb[6].mxu0 }
 0x2f2   : > { %v680_v6 = vpop.f32.mrb[6].mxu1  ;;  %v611_v7 = vpop.f32.mrb[7].mxu0  ;;  %v610_v10 = vadd.f32 %v609_v5, %v538_v4 }
 0x2f3   : > { %v612_v8 = vadd.f32 %v611_v7, %v538_v4  ;;  %v682_v9 = vpop.f32.mrb[7].mxu1  ;;  %v681_v12 = vadd.f32 %v680_v6, %v538_v4 }
 0x2f4   : > { %v683_v11 = vadd.f32 %v682_v9, %v538_v4 }
 0x2f5   : > { %1329 = vmatprep.subr.msk.mxu0 %vm694_vm6, %v612_v8 }
 0x2f6   : > { %1332 = vmatprep.subr.msk.mxu1 %vm694_vm6, %v683_v11  ;;  %1330 = vmatpush1.msk.msra.mxu0 %vm694_vm6, %v610_v10 }
 0x2f7   : > { %1333 = vmatpush1.msk.msra.mxu1 %vm694_vm6, %v681_v12  ;;  %1331 = vmatmul.mubr.msk.f32.vlgmr.msra.gmra.mrb[8].mxu0 %vm691_vm7, %v1774_v17 }
 0x2f8   : > { %1334 = vmatmul.mubr.msk.f32.vlgmr.msra.gmra.mrb[8].mxu1 %vm691_vm7, %v1774_v17  ;;  %933 = vmatprep.mubr.f32.mxu0 %v1585_v0 }
 0x2f9   : > { %1010 = vmatprep.mubr.f32.mxu1 %v1585_v0 }
 0x3ca   : > { %v773_v14 = vpop.f32.mrb[8].mxu0 }
 0x3cb   : > { %v774_v15 = vadd.f32 %v773_v14, %v689_v13  ;;  %v844_v16 = vpop.f32.mrb[8].mxu1  ;;  %v775_v20 = vpop.f32.mrb[9].mxu0 }
 0x3cc   : > { %v845_v21 = vadd.f32 %v844_v16, %v689_v13  ;;  %v776_v24 = vadd.f32 %v775_v20, %v689_v13  ;;  %v846_v25 = vpop.f32.mrb[9].mxu1 }
 0x3cd   : > { %v847_v26 = vadd.f32 %v846_v25, %v689_v13  ;;  %v849_v28 = vmax.f32 %v774_v15, 0.0 }
 0x3ce   : > { %v850_v27 = vmax.f32 %v776_v24, 0.0  ;;  %v851_v30 = vmax.f32 %v845_v21, 0.0 }
 0x3cf   : > { %v852_v29 = vmax.f32 %v847_v26, 0.0 }
 0x3d0   : > { %869 = vmatprep.subr.mxu0 %v850_v27 }
 0x3d1   : > { %946 = vmatprep.subr.mxu1 %v852_v29  ;;  %870 = vmatpush1.msra.mxu0 %v849_v28 }
 0x3d2   : > { %947 = vmatpush1.msra.mxu1 %v851_v30  ;;  %1335 = vmatmul.mubr.msk.f32.vlgmr.msra.gmra.mrb[10].mxu0 %vm540_vm5, %v1789_v22 }
 0x3d3   : > { %1337 = vmatmul.mubr.msk.f32.vlgmr.msra.gmra.mrb[10].mxu1 %vm540_vm5, %v1789_v22  ;;  %939 = vmatprep.mubr.f32.mxu0 %v1585_v0 }
 0x3d4   : > { %1016 = vmatprep.mubr.f32.mxu1 %v1585_v0 }
 0x3d6   : > { %1336 = vmatmul.mubr.msk.f32.gmra.mrb[12].mxu0 %vm540_vm5, %v1778_v18 }
 0x3d7   : > { %1338 = vmatmul.mubr.msk.f32.gmra.mrb[12].mxu1 %vm540_vm5, %v1778_v18  ;;  %1111 = vmatprep.mubr.f32.mxu0 %v1585_v0 }
 0x3d8   : > { %1188 = vmatprep.mubr.f32.mxu1 %v1585_v0 }
 0x4a5   : > { %v935_v17 = vpop.f32.mrb[10].mxu0 }
 0x4a6   : > { %v1012_v31 = vpop.f32.mrb[10].mxu1  ;;  %v937_v32 = vpop.f32.mrb[11].mxu0  ;;  %v936_v22 = vadd.f32 %v935_v17, %v858_v33 }
 0x4a7   : > { %v1014_v34 = vpop.f32.mrb[11].mxu1  ;;  %v1013_v36 = vadd.f32 %v1012_v31, %v858_v33  ;;  %v938_v37 = vadd.f32 %v937_v32, %v858_v33 }
 0x4a8   : > { %v1015_v39 = vadd.f32 %v1014_v34, %v858_v33  ;;  %v1023_v45 = vmax.f32 %v936_v22, 0.0 }
 0x4a9   : > { %v941_v38 = vpop.f32.mrb[12].mxu0  ;;  %v1025_v48 = vmax.f32 %v1013_v36, 0.0  ;;  %v1024_v49 = vmax.f32 %v938_v37, 0.0 }
 0x4aa   : > { %v942_v40 = vadd.f32 %v941_v38, %v863_v35  ;;  %v1018_v41 = vpop.f32.mrb[12].mxu1  ;;  %v943_v42 = vpop.f32.mrb[13].mxu0  ;;  %v1026_v52 = vmax.f32 %v1015_v39, 0.0 }
 0x4ab   : > { %v1019_v43 = vadd.f32 %v1018_v41, %v863_v35  ;;  %v944_v18 = vadd.f32 %v943_v42, %v863_v35  ;;  %v1020_v44 = vpop.f32.mrb[13].mxu1 }
 0x4ac   : > { %v1027_v46 = vmax.f32 %v942_v40, 0.0  ;;  %v1021_v47 = vadd.f32 %v1020_v44, %v863_v35 }
 0x4ad   : > { %v1029_v50 = vmax.f32 %v1019_v43, 0.0  ;;  %v1028_v51 = vmax.f32 %v944_v18, 0.0 }
 0x4ae   : > { %v1372_v53 = vpack.c.bf16 %v1027_v46, %v1023_v45  ;;  %v1030_v54 = vmax.f32 %v1021_v47, 0.0 }
 0x4af   : > { %v1376_v55 = vpack.c.bf16 %v1029_v50, %v1025_v48  ;;  %v1370_v56 = vpack.c.bf16 %v1028_v51, %v1024_v49 }
 0x4b0   : > { %v1374_v57 = vpack.c.bf16 %v1030_v54, %v1026_v52 }
 0x4b1   : > { %1371 = vmatprep.subr.bf16.mxu0 %v1370_v56 }
 0x4b2   : > { %1375 = vmatprep.subr.bf16.mxu1 %v1374_v57  ;;  %1373 = vmatpush1.bf16.msra.mxu0 %v1372_v53 }
 0x4b3   : > { %1377 = vmatpush1.bf16.msra.mxu1 %v1376_v55 }
 0x4b5   : > { %1339 = vmatmul.mubr.msk.f32.vlgmr.msra.gmra.mrb[14].mxu0 %vm385_vm4, %v1792_v23 }
 0x4b6   : > { %1341 = vmatmul.mubr.msk.f32.vlgmr.msra.gmra.mrb[14].mxu1 %vm385_vm4, %v1792_v23  ;;  %1117 = vmatprep.mubr.f32.mxu0 %v1585_v0 }
 0x4b7   : > { %1194 = vmatprep.mubr.f32.mxu1 %v1585_v0  ;;  %v1041_v0 = vpop.permute.xlu0 %1040 }
 0x4b9   : > { %1340 = vmatmul.mubr.msk.f32.gmra.mrb[16].mxu0 %vm385_vm4, %v1783_v19 }
 0x4ba   : > { %1342 = vmatmul.mubr.msk.f32.gmra.mrb[16].mxu1 %vm385_vm4, %v1783_v19 }
 0x588   : > { %v1113_v59 = vpop.f32.mrb[14].mxu0 }
 0x589   : > { %v1114_v60 = vadd.f32 %v1113_v59, %v1036_v58  ;;  %v1190_v61 = vpop.f32.mrb[14].mxu1  ;;  %v1115_v62 = vpop.f32.mrb[15].mxu0 }
 0x58a   : > { %v1191_v23 = vadd.f32 %v1190_v61, %v1036_v58  ;;  %v1116_v63 = vadd.f32 %v1115_v62, %v1036_v58  ;;  %v1192_v1 = vpop.f32.mrb[15].mxu1 }
 0x58b   : > { %1201 = vst [vmem:[%s176_s20] sm:$0xff] %v1114_v60  ;;  %v1193_v2 = vadd.f32 %v1192_v1, %v1036_v58 }
 0x58c   : > { %1203 = vst [vmem:[%s176_s20 + $0x10] sm:$0xff] %v1191_v23  ;;  %1202 = vst [vmem:[%s176_s20 + $0x8] sm:$0xff] %v1116_v63  ;;  %v1119_v3 = vpop.f32.mrb[16].mxu0 }
 0x58d   : > { %1204 = vst [vmem:[%s176_s20 + $0x18] sm:$0xff] %v1193_v2  ;;  %v1120_v19 = vadd.f32 %v1119_v3, %v1041_v0  ;;  %v1196_v4 = vpop.f32.mrb[16].mxu1  ;;  %v1121_v5 = vpop.f32.mrb[17].mxu0 }
 0x58e   : > { %v1197_v6 = vadd.f32 %v1196_v4, %v1041_v0  ;;  %v1122_v7 = vadd.f32 %v1121_v5, %v1041_v0  ;;  %v1198_v8 = vpop.f32.mrb[17].mxu1 }
 0x58f   : > { %1205 = vst [vmem:[%s176_s20 + $0x20] sm:$0x1] %v1120_v19  ;;  %v1199_v9 = vadd.f32 %v1198_v8, %v1041_v0 }
 0x590   : > { %1207 = vst [vmem:[%s176_s20 + $0x30] sm:$0x1] %v1197_v6  ;;  %1206 = vst [vmem:[%s176_s20 + $0x28] sm:$0x1] %v1122_v7 }
 0x591   : > { %1208 = vst [vmem:[%s176_s20 + $0x38] sm:$0x1] %v1199_v9 }
 0x592   : > { %1519 = shalt.err (!%p1516_p11)
}
 0x593   : > { %s1520_s28 = scalar_lea.hbm %s1839_s13, 1024  ;;  %s1524_s3 = scalar_lea.hbm %s1885_s2, 2048 }
 0x594   : > { %p1521_p13 = scmp.ne.s32.totalorder %s1839_s13, %s1520_s28  ;;  %p1525_p12 = scmp.lt.u32.totalorder %s1839_s13, %s1885_s2 }
 0x595   : > { %p1526_p0 = scmp.lt.u32.totalorder %s1524_s3, %s1520_s28  ;;  %p1528_p8 = scmp.lt.u32.totalorder %s1520_s28, %s1839_s13 }
 0x596   : > { %p1522_p2 = pnand %p1521_p13, %p1905_p9 }
 0x597   : > { %p1527_p3 = por %p1526_p0, %p1525_p12 }
 0x598   : > { %p1523_p6 = pneg %p1522_p2 }
 0x599   : > { %p1529_p10 = por %p1528_p8, %p1527_p3 }
 0x59b   : > { %p1530_p1 = pnand %p1529_p10, %p1523_p6 }
 0x59d   : > { %1533 = shalt.err (!%p1530_p1)
}
 0x59e   : > { %s1589_s7 = smov 512   ;;  %s1590_s8 = smov 1024  }
 0x59f   : > { %s1591_s20 = smov 32  }
 0x5a0   : > { %1384 = dma.vmem_to_hbm [thread:$0]  (%p1905_p9), %s1834_s23, 1024, %s1839_s13, %s1210_s26, %s1589_s7, %s1590_s8, %s1591_s20  }
 0x5a1 PF: > { %s1238_s24 = sand.u32 1, %s1564_s9   ;;  %p1906_p4 = scmp.ne.s32.totalorder %s1893_s22, 0 }
 0x5a2   : > { %p1907_p7 = scmp.ge.s32.totalorder %s1576_s12, 2  ;;  %s1239_s4 = scalar_lea.sflag [#allocation4], %s1238_s24 }
 0x5a4   : > { %p1395_p5 = pnand %p1907_p7, %p1906_p4 }
 0x5a6   : > { %1559 = dma.done.wait (!%p1395_p5), %s1239_s4, 1024  }
 0x5a7   : > { %1561 = vsyncadd (!%p1395_p5), %s1239_s4, 4294966272  ;;  %p16_p11 = scmp.ge.s32.totalorder %s1632_s15, 4   ;;  %s1908_s9 = smov %s1568_s10 }
 0x5a8   : > { %s1909_s10 = smov %s1572_s11  ;;  %s1910_s11 = smov %s1644_s18 }
 0x5a9   : > { %s1911_s12 = smov %s1632_s15  ;;  %18 = sbr.rel (!%p16_p11) target bundleno = 6 (0x6), region = 77 }
 0x5b0   :  { %1244 = vsyncpa [#allocation3], 1 }
 0x5b1   :  { %1246 = vsyncpa [#allocation3 + $0x1], 1 }
 0x5b2   :  { %1247 = vsyncpa [#allocation6], 1 }
 0x5b3   :  { %1248 = vsyncpa [#allocation4], 1 }
 0x5b4   :  { %1250 = vsyncpa [#allocation4 + $0x1], 1 }

</bundles_post_ra>
